<compile_context>
chip_gen: v7x
topology: tpu7x:2x2x1
jax: 0.10.0
libtpu: 0.0.40
codegen_flags: <defaults>
</compile_context>

<pallas_src>
import math
from functools import partial

import jax
import jax.numpy as jnp
from jax.experimental import pallas as pl
from jax.experimental.pallas import tpu as pltpu


def _lyapunov_kernel(xt_ref, w1t_ref, b1_ref, w2t_ref, b2_ref, w3r_ref, c0_ref,
                     out_ref, *, alpha):
    xt = xt_ref[...]                                      # (dim, tb) f32
    w1t = w1t_ref[...]
    w2t = w2t_ref[...]
    w3r = w3r_ref[...]
    md = w1t.dtype                                        # matmul/activation dtype

    # Layer 1 on the MXU: (H1, dim) @ (dim, tb) -> (H1, tb), f32 accumulation;
    # bias add + tanh in md (bf16 on v6e/v7x, f32 on v5e).
    a1 = jnp.dot(w1t, xt.astype(md), preferred_element_type=jnp.float32)
    h1 = jnp.tanh(a1.astype(md) + b1_ref[...])

    # Layer 2: (H2, H1) @ (H1, tb) -> (H2, tb).
    a2 = jnp.dot(w2t, h1, preferred_element_type=jnp.float32)
    h2 = jnp.tanh(a2.astype(md) + b2_ref[...])

    # Layer 3 + phi(0): (1, H2) @ (H2, tb) -> (1, tb) already lane-major.
    # b3 cancels exactly; phi(0) is the precomputed scalar c0 (same precision
    # path as the kernel), read from SMEM.
    a3 = jnp.dot(w3r, h2, preferred_element_type=jnp.float32)
    phi_diff = jnp.abs(a3 - c0_ref[0])

    # alpha * ||x||_2 over the state (sublane) dim, f32 -> (1, tb).
    nrm = alpha * jnp.sqrt(jnp.sum(xt * xt, axis=0, keepdims=True))

    out_ref[...] = phi_diff + nrm                         # lane-dense (1, tb) store


def _round_up(a, m):
    return (a + m - 1) // m * m


def _default_matmul_dtype():
    """bf16 activations/tanh only where the VPU/EUP support them (v6e/v7x)."""
    try:
        kind = jax.devices()[0].device_kind.lower()
    except Exception:
        return jnp.float32
    if "v6" in kind or "v7" in kind:
        return jnp.bfloat16
    return jnp.float32


def _select_tiling(B, block_b):
    """Pick (block_b, num_tiles); big tiles, even tile counts for v7x megacore."""
    b_r8 = _round_up(B, 8)
    if block_b >= b_r8:
        return b_r8, 1                      # whole batch in one tile
    block_b = _round_up(block_b, 128)
    num = -(-B // block_b)
    # Keep the tile count even so the "parallel" grid axis load-balances v7x's
    # two TensorCores -- but only once per-tile work clearly dwarfs the
    # ~0.35us grid-step overhead.
    if num > 1 and num % 2 == 1:
        alt = _round_up(-(-B // (num + 1)), 128)
        if alt >= 512:
            block_b = alt
            num = -(-B // block_b)
    return block_b, num


def _vmem_budget(dim, h1d, h2d, block_b, act_bytes):
    """Explicit VMEM budget (bytes) with headroom, capped below v7x's 64 MiB."""
    lane = lambda n: _round_up(n, 128)
    sub = lambda n: _round_up(n, 8)
    x_tile = sub(dim) * lane(block_b) * 4 * 2                 # double-buffered
    out_tile = sub(1) * lane(block_b) * 4 * 2
    inter = 4 * sub(max(h1d, h2d)) * lane(block_b) * max(4, act_bytes)
    weights = (sub(h1d) * lane(dim) + sub(h2d) * lane(h1d) + sub(1) * lane(h2d)
               + sub(h1d) * lane(1) + sub(h2d) * lane(1)) * 4 * 2
    est = x_tile + out_tile + inter + weights
    return int(min(max(32 << 20, 2 * est), 48 << 20))


def lyapunov_net_forward(x, params, alpha=1e-3, *, block_b=4096,
                         matmul_dtype=None, x_transposed=False):
    """x: (B, dim) float32 (or (dim, B) if x_transposed).  Returns (B, 1) f32."""
    if matmul_dtype is None:
        matmul_dtype = _default_matmul_dtype()
    md = jnp.dtype(matmul_dtype)

    w1, b1, w2, b2, w3, b3 = params
    dim, h1d = w1.shape
    h2d = w2.shape[1]
    if x_transposed:
        dim_x, B = x.shape
    else:
        B, dim_x = x.shape
    assert dim_x == dim

    # Feature-major weights so every in-kernel vreg is lane-dense.
    w1t = w1.T.astype(md)                    # (H1, dim)
    w2t = w2.T.astype(md)                    # (H2, H1)
    w3r = w3.reshape(1, h2d).astype(md)      # (1, H2)
    b1c = b1.reshape(h1d, 1).astype(md)      # (H1, 1)
    b2c = b2.reshape(h2d, 1).astype(md)      # (H2, 1)

    # phi(0) folded into one scalar (b3 cancels): c0 = w3r @ tanh(w2t@tanh(b1)+b2).
    # Computed with the SAME precision path as the kernel for parity.
    h1_0 = jnp.tanh(b1c)
    a2_0 = jnp.dot(w2t, h1_0, preferred_element_type=jnp.float32)
    h2_0 = jnp.tanh(a2_0.astype(md) + b2c)
    c0 = jnp.dot(w3r, h2_0, preferred_element_type=jnp.float32).reshape(1)

    block_b, num_tiles = _select_tiling(B, block_b)
    B_pad = num_tiles * block_b

    if x_transposed:
        xt = x if B_pad == B else jnp.pad(x, ((0, 0), (0, B_pad - B)))
    else:
        if B_pad != B:
            x = jnp.pad(x, ((0, B_pad - B), (0, 0)))
        # One extra HBM pass over x; pass x_transposed=True to avoid it if the
        # producer can emit feature-major states.
        xt = x.T
    xt = xt.astype(jnp.float32)

    full = lambda r, c: pl.BlockSpec((r, c), lambda i: (0, 0))

    out = pl.pallas_call(
        partial(_lyapunov_kernel, alpha=float(alpha)),
        out_shape=jax.ShapeDtypeStruct((1, B_pad), jnp.float32),
        grid=(num_tiles,),
        in_specs=[
            pl.BlockSpec((dim, block_b), lambda i: (0, i)),      # x^T tile
            full(h1d, dim), full(h1d, 1),                        # layer 1
            full(h2d, h1d), full(h2d, 1),                        # layer 2
            full(1, h2d),                                        # w3 as a row
            pl.BlockSpec(memory_space=pltpu.MemorySpace.SMEM),   # c0 scalar
        ],
        out_specs=pl.BlockSpec((1, block_b), lambda i: (0, i)),
        compiler_params=pltpu.CompilerParams(
            dimension_semantics=("parallel",),
            vmem_limit_bytes=_vmem_budget(dim, h1d, h2d, block_b, md.itemsize)),
    )(xt, w1t, b1c, w2t, b2c, w3r, c0)

    return out.reshape(B_pad, 1)[:B]


def init_params(key, dim, hidden_dims=(64, 64)):
    """Deterministic synthetic init matching the module's shapes.

    Weights ~ kaiming_uniform with tanh gain; biases small nonzero values so
    the phi(0) path is exercised non-trivially (the module itself uses zeros).
    """
    dims = (dim,) + tuple(hidden_dims) + (1,)
    params = []
    gain = 5.0 / 3.0
    for i in range(len(dims) - 1):
        fan_in, fan_out = dims[i], dims[i + 1]
        key, kw, kb = jax.random.split(key, 3)
        bound = math.sqrt(3.0) * gain / math.sqrt(fan_in)
        w = jax.random.uniform(kw, (fan_in, fan_out), jnp.float32, -bound, bound)
        b = 0.01 * jax.random.normal(kb, (1, fan_out), jnp.float32)
        params.extend([w, b])
    return params


def reference_forward(x, params, alpha=1e-3):
    w1, b1, w2, b2, w3, b3 = params

    def phi(z):
        h = jnp.tanh(z @ w1 + b1)
        h = jnp.tanh(h @ w2 + b2)
        return h @ w3 + b3

    phi_diff = jnp.abs(phi(x) - phi(jnp.zeros_like(x)))
    norm = alpha * jnp.linalg.norm(x, axis=-1, keepdims=True)
    return phi_diff + norm


# TODO(synk): compute_gradient / save / load are training-time utilities, not
# part of the forward pass; they are not implemented as kernels.

if __name__ == "__main__":
    key = jax.random.PRNGKey(0)
    dim = 8
    alpha = 1e-3

    kx1, kx2, kp = jax.random.split(key, 3)
    params = init_params(kp, dim, hidden_dims=(64, 64))

    # Case 1: small batch -> single tile, f32 path, tight tolerance.
    x1 = jax.random.normal(kx1, (16, dim), jnp.float32)
    r1 = reference_forward(x1, params, alpha)
    v1 = jax.block_until_ready(
        lyapunov_net_forward(x1, params, alpha=alpha, matmul_dtype=jnp.float32))
    assert v1.shape == (16, 1)
    assert jnp.allclose(v1, r1, atol=1e-4, rtol=1e-4)

    # Case 2: ragged batch -> multi-tile grid with a zero-padded tail tile.
    x2 = jax.random.normal(kx2, (200, dim), jnp.float32)
    r2 = reference_forward(x2, params, alpha)
    v2 = jax.block_until_ready(
        lyapunov_net_forward(x2, params, alpha=alpha, block_b=128,
                             matmul_dtype=jnp.float32))
    assert v2.shape == (200, 1)
    assert jnp.allclose(v2, r2, atol=1e-4, rtol=1e-4)

    # Case 3: explicit bf16 matmul + bf16 activation path (v6e/v7x fast path).
    v3 = jax.block_until_ready(
        lyapunov_net_forward(x2, params, alpha=alpha, block_b=128,
                             matmul_dtype=jnp.bfloat16))
    assert v3.shape == (200, 1)
    assert jnp.allclose(v3, r2, atol=5e-2, rtol=5e-2)

    # Case 4: default settings (auto dtype by chip, big default tile).
    v4 = jax.block_until_ready(lyapunov_net_forward(x2, params, alpha=alpha))
    assert v4.shape == (200, 1)
    assert jnp.allclose(v4, r2, atol=5e-2, rtol=5e-2)

    # Case 5: caller supplies a feature-major (dim, B) input -> no wrapper
    # transpose / extra HBM pass.
    v5 = jax.block_until_ready(
        lyapunov_net_forward(x1.T, params, alpha=alpha,
                             matmul_dtype=jnp.float32, x_transposed=True))
    assert v5.shape == (16, 1)
    assert jnp.allclose(v5, r1, atol=1e-4, rtol=1e-4)

    print("KERNEL_OK")
</pallas_src>

<mosaic_0001>
module attributes {stable_mosaic.version = 11 : i64} {
  func.func @_lyapunov_kernel(%arg0: i32, %arg1: memref<8x16xf32, #tpu.memory_space<vmem>>, %arg2: memref<64x8xf32, #tpu.memory_space<vmem>>, %arg3: memref<64x1xf32, #tpu.memory_space<vmem>>, %arg4: memref<64x64xf32, #tpu.memory_space<vmem>>, %arg5: memref<64x1xf32, #tpu.memory_space<vmem>>, %arg6: memref<1x64xf32, #tpu.memory_space<vmem>>, %arg7: memref<1xf32, #tpu.memory_space<smem>>, %arg8: memref<1x16xf32, #tpu.memory_space<vmem>>) attributes {dimension_semantics = [#tpu.dimension_semantics<parallel>], iteration_bounds = array<i64: 1>, scalar_prefetch = 0 : i64, scratch_operands = 0 : i64, tpu.core_type = #tpu.core_type<tc>, window_params = [{transform_indices = @transform_0, window_bounds = array<i64: 8, 16>}, {pipeline_mode = #tpu.pipeline_mode<synchronous>, transform_indices = @transform_1, window_bounds = array<i64: 64, 8>}, {pipeline_mode = #tpu.pipeline_mode<synchronous>, transform_indices = @transform_2, window_bounds = array<i64: 64, 1>}, {pipeline_mode = #tpu.pipeline_mode<synchronous>, transform_indices = @transform_3, window_bounds = array<i64: 64, 64>}, {pipeline_mode = #tpu.pipeline_mode<synchronous>, transform_indices = @transform_4, window_bounds = array<i64: 64, 1>}, {pipeline_mode = #tpu.pipeline_mode<synchronous>, transform_indices = @transform_5, window_bounds = array<i64: 1, 64>}, {transform_indices = @transform_6, window_bounds = array<i64: 1>}, {transform_indices = @transform_7, window_bounds = array<i64: 1, 16>}]} {
    %c0 = arith.constant 0 : index
    %c0_0 = arith.constant 0 : index
    %0 = vector.load %arg1[%c0, %c0_0] : memref<8x16xf32, #tpu.memory_space<vmem>>, vector<8x16xf32>
    %c0_1 = arith.constant 0 : index
    %c0_2 = arith.constant 0 : index
    %1 = vector.load %arg2[%c0_1, %c0_2] : memref<64x8xf32, #tpu.memory_space<vmem>>, vector<64x8xf32>
    %c0_3 = arith.constant 0 : index
    %c0_4 = arith.constant 0 : index
    %2 = vector.load %arg4[%c0_3, %c0_4] : memref<64x64xf32, #tpu.memory_space<vmem>>, vector<64x64xf32>
    %c0_5 = arith.constant 0 : index
    %c0_6 = arith.constant 0 : index
    %3 = vector.load %arg6[%c0_5, %c0_6] : memref<1x64xf32, #tpu.memory_space<vmem>>, vector<1x64xf32>
    %cst = arith.constant dense<0.000000e+00> : vector<64x16xf32>
    %4 = tpu.matmul %1, %0, %cst {dimension_numbers = #tpu.dot_dimension_numbers<[1], [0], [0], [1], [0, 0, 1, 1], [], []>} : vector<64x8xf32>, vector<8x16xf32>, vector<64x16xf32> -> vector<64x16xf32>
    %c0_7 = arith.constant 0 : index
    %c0_8 = arith.constant 0 : index
    %5 = vector.load %arg3[%c0_7, %c0_8] : memref<64x1xf32, #tpu.memory_space<vmem>>, vector<64x1xf32>
    %6 = vector.broadcast %5 : vector<64x1xf32> to vector<64x16xf32>
    %7 = arith.addf %4, %6 : vector<64x16xf32>
    %8 = math.tanh %7 : vector<64x16xf32>
    %cst_9 = arith.constant dense<0.000000e+00> : vector<64x16xf32>
    %9 = tpu.matmul %2, %8, %cst_9 {dimension_numbers = #tpu.dot_dimension_numbers<[1], [0], [0], [1], [0, 0, 1, 1], [], []>} : vector<64x64xf32>, vector<64x16xf32>, vector<64x16xf32> -> vector<64x16xf32>
    %c0_10 = arith.constant 0 : index
    %c0_11 = arith.constant 0 : index
    %10 = vector.load %arg5[%c0_10, %c0_11] : memref<64x1xf32, #tpu.memory_space<vmem>>, vector<64x1xf32>
    %11 = vector.broadcast %10 : vector<64x1xf32> to vector<64x16xf32>
    %12 = arith.addf %9, %11 : vector<64x16xf32>
    %13 = math.tanh %12 : vector<64x16xf32>
    %cst_12 = arith.constant dense<0.000000e+00> : vector<1x16xf32>
    %14 = tpu.matmul %3, %13, %cst_12 {dimension_numbers = #tpu.dot_dimension_numbers<[1], [0], [0], [1], [0, 0, 1, 1], [], []>} : vector<1x64xf32>, vector<64x16xf32>, vector<1x16xf32> -> vector<1x16xf32>
    %c0_13 = arith.constant 0 : index
    %15 = memref.load %arg7[%c0_13] : memref<1xf32, #tpu.memory_space<smem>>
    %16 = vector.broadcast %15 : f32 to vector<1x16xf32>
    %17 = arith.subf %14, %16 : vector<1x16xf32>
    %18 = math.absf %17 : vector<1x16xf32>
    %19 = arith.mulf %0, %0 : vector<8x16xf32>
    %cst_14 = arith.constant dense<0.000000e+00> : vector<16xf32>
    %20 = vector.multi_reduction <add>, %19, %cst_14 [0] : vector<8x16xf32> to vector<16xf32>
    %21 = vector.shape_cast %20 : vector<16xf32> to vector<1x16xf32>
    %22 = math.sqrt %21 : vector<1x16xf32>
    %cst_15 = arith.constant 1.000000e-03 : f32
    %23 = vector.broadcast %cst_15 : f32 to vector<1x16xf32>
    %24 = arith.mulf %23, %22 : vector<1x16xf32>
    %25 = arith.addf %18, %24 : vector<1x16xf32>
    %c0_16 = arith.constant 0 : index
    %c0_17 = arith.constant 0 : index
    %26 = vector.load %arg8[%c0_16, %c0_17] : memref<1x16xf32, #tpu.memory_space<vmem>>, vector<1x16xf32>
    tpu.vector_store %arg8[%c0_16, %c0_17], %25 {strides = array<i32>} : memref<1x16xf32, #tpu.memory_space<vmem>>, vector<1x16xf32>,
    return
  }
  func.func @transform_0(%arg0: i32) -> (i32, i32) {
    %c0_i32 = arith.constant 0 : i32
    %c0_i32_0 = arith.constant 0 : i32
    return %c0_i32, %arg0 : i32, i32
  }
  func.func @transform_1(%arg0: i32) -> (i32, i32) {
    %c0_i32 = arith.constant 0 : i32
    %c0_i32_0 = arith.constant 0 : i32
    %c0_i32_1 = arith.constant 0 : i32
    return %c0_i32, %c0_i32_0 : i32, i32
  }
  func.func @transform_2(%arg0: i32) -> (i32, i32) {
    %c0_i32 = arith.constant 0 : i32
    %c0_i32_0 = arith.constant 0 : i32
    %c0_i32_1 = arith.constant 0 : i32
    return %c0_i32, %c0_i32_0 : i32, i32
  }
  func.func @transform_3(%arg0: i32) -> (i32, i32) {
    %c0_i32 = arith.constant 0 : i32
    %c0_i32_0 = arith.constant 0 : i32
    %c0_i32_1 = arith.constant 0 : i32
    return %c0_i32, %c0_i32_0 : i32, i32
  }
  func.func @transform_4(%arg0: i32) -> (i32, i32) {
    %c0_i32 = arith.constant 0 : i32
    %c0_i32_0 = arith.constant 0 : i32
    %c0_i32_1 = arith.constant 0 : i32
    return %c0_i32, %c0_i32_0 : i32, i32
  }
  func.func @transform_5(%arg0: i32) -> (i32, i32) {
    %c0_i32 = arith.constant 0 : i32
    %c0_i32_0 = arith.constant 0 : i32
    %c0_i32_1 = arith.constant 0 : i32
    return %c0_i32, %c0_i32_0 : i32, i32
  }
  func.func @transform_6(%arg0: i32) -> i32 {
    %c0_i32 = arith.constant 0 : i32
    %c0_i32_0 = arith.constant 0 : i32
    return %c0_i32 : i32
  }
  func.func @transform_7(%arg0: i32) -> (i32, i32) {
    %c0_i32 = arith.constant 0 : i32
    %c0_i32_0 = arith.constant 0 : i32
    return %c0_i32, %arg0 : i32, i32
  }
}

</mosaic_0001>

<bundles_post_ra>
// kernel: tpu_custom_call.1
= control target key start
LH: loop header
LB: loop body
LE: loop exit
PB: predicated region body
PF: predicated region fallthrough
CT: control target
= control target key end

     0   :  { %vm94_vm0 = vcmask 64512   ;;  %v734_v4 = vmov 0   ;;  %s919_s0 = inlined_call_operand.vmem [shape: f32[8,16], index: 0, kind: input, shape index: {}]   ;;  %s920_s1 = inlined_call_operand.vmem [shape: f32[64,8], index: 1, kind: input, shape index: {}]   ;;  %s921_s2 = inlined_call_operand.vmem [shape: f32[64,1], index: 2, kind: input, shape index: {}]   ;;  %s922_s3 = inlined_call_operand.vmem [shape: f32[64,64], index: 3, kind: input, shape index: {}]   ;;  %s923_s4 = inlined_call_operand.vmem [shape: f32[64,1], index: 4, kind: input, shape index: {}]   ;;  %s924_s5 = inlined_call_operand.vmem [shape: f32[1,64], index: 5, kind: input, shape index: {}]   ;;  %s925_s6 = inlined_call_operand.<no memory space> [shape: f32[1], index: 6, kind: input, shape index: {}]   ;;  %s926_s7 = inlined_call_operand.hbm [shape: f32[1,16], index: 7, kind: output, shape index: {}]  }
   0x1   :  { %v782_v0 = vld [vmem:[%s919_s0] sm:$0xff]  ;;  %v30_v2 = vld [vmem:[%s920_s1 + $0x8] sm:$0xff]  ;;  %v31_v3 = vld [vmem:[%s920_s1 + $0x10] sm:$0xff]  ;;  %674 = vset.pattern.permute.xlu0 %v734_v4  ;;  %675 = vset.pattern.permute.xlu1 %v734_v4 }
   0x2   :  { %v29_v1 = vld [vmem:[%s920_s1] sm:$0xff]  ;;  %580 = vmatprep.subr.mxu0 %v782_v0  ;;  %v48_v6 = vld [vmem:[%s921_s2 + $0x10] sm:$0xff]  ;;  %v32_v7 = vld [vmem:[%s920_s1 + $0x18] sm:$0xff] }
   0x3   :  { %582 = vmatprep.mubr.msk.f32.mxu0 %vm94_vm0, %v29_v1  ;;  %581 = vmatpush3.msra.mxu0 %v782_v0  ;;  %v46_v5 = vld [vmem:[%s921_s2] sm:$0xff]  ;;  %v47_v9 = vld [vmem:[%s921_s2 + $0x8] sm:$0xff]  ;;  %v49_v10 = vld [vmem:[%s921_s2 + $0x18] sm:$0xff] }
   0x4   :  { %583 = vmatmul.mubr.msk.f32.vlgmr.msra.gmra.mrb[0].mxu0 %vm94_vm0, %v30_v2  ;;  %56 = vperm.xlu0 %674, %v46_v5   ;;  %v33_v8 = vld [vmem:[%s920_s1 + $0x20] sm:$0xff]  ;;  %v34_v11 = vld [vmem:[%s920_s1 + $0x28] sm:$0xff] }
   0x5   :  { %585 = vmatprep.mubr.msk.f32.mxu0 %vm94_vm0, %v31_v3  ;;  %66 = vperm.xlu1 %675, %v48_v6  }
   0x8   :  { %586 = vmatmul.mubr.msk.f32.gmra.mrb[2].mxu0 %vm94_vm0, %v32_v7  ;;  %61 = vperm.xlu0 %674, %v47_v9  }
   0x9   :  { %588 = vmatprep.mubr.msk.f32.mxu0 %vm94_vm0, %v33_v8 }
   0xa   :  { %13 = vsyncpa [#allocation4], 0  ;;  %v35_v12 = vld [vmem:[%s920_s1 + $0x30] sm:$0xff]  ;;  %71 = vperm.xlu1 %675, %v49_v10   ;;  %v50_v13 = vld [vmem:[%s921_s2 + $0x20] sm:$0xff]  ;;  %vm280_vm1 = vcmask 523264   ;;  %v735_v7 = vmov 0.0|0.0  }
   0xb   :  { %v51_v14 = vld [vmem:[%s921_s2 + $0x28] sm:$0xff]  ;;  %v36_v15 = vld [vmem:[%s920_s1 + $0x38] sm:$0xff]  ;;  %v52_v16 = vld [vmem:[%s921_s2 + $0x30] sm:$0xff]  ;;  %657 = vmatprep.subr.bf16.mxu0 %v735_v7  ;;  %vm736_vm2 = vmmov 0   ;;  %v737_v8 = vmov 0.0   ;;  %vm496_vm3 = vcmask 130048  }
   0xc   :  { %589 = vmatmul.mubr.msk.f32.gmra.mrb[4].mxu0 %vm94_vm0, %v34_v11  ;;  %76 = vperm.xlu0 %674, %v50_v13   ;;  %v53_v17 = vld [vmem:[%s921_s2 + $0x38] sm:$0xff]  ;;  %v232_v18 = vld [vmem:[%s923_s4] sm:$0xff]  ;;  %v233_v19 = vld [vmem:[%s923_s4 + $0x8] sm:$0xff]  ;;  %s738_s2 = smov [#allocation3]   ;;  %vm513_vm6 = vcmask 122880  }
   0xd   :  { %591 = vmatprep.mubr.msk.f32.mxu0 %vm94_vm0, %v35_v12  ;;  %v234_v20 = vld [vmem:[%s923_s4 + $0x10] sm:$0xff]  ;;  %v235_v21 = vld [vmem:[%s923_s4 + $0x18] sm:$0xff]  ;;  %v236_v22 = vld [vmem:[%s923_s4 + $0x20] sm:$0xff]  ;;  %s521_s16 = sshll.u32 %s738_s2, 4  ;;  %s522_s16 = int_to_ptr.vmem [resolvable:$true] %s521_s16 }
   0xe   :  { %81 = vperm.xlu1 %675, %v51_v14   ;;  %v237_v23 = vld [vmem:[%s923_s4 + $0x28] sm:$0xff]  ;;  %v238_v24 = vld [vmem:[%s923_s4 + $0x30] sm:$0xff]  ;;  %v239_v25 = vld [vmem:[%s923_s4 + $0x38] sm:$0xff]  ;;  %s710_s17 = scalar_lea.vmem %s522_s16, 16  ;;  %s714_s18 = scalar_lea.vmem %s522_s16, 32 }
   0xf   :  { %v37_v26 = vld [vmem:[%s922_s3] sm:$0xff]  ;;  %v38_v63 = vld [vmem:[%s922_s3 + $0x8] sm:$0xff]  ;;  %v39_v1 = vld [vmem:[%s922_s3 + $0x10] sm:$0xff]  ;;  %p711_p0 = scmp.ne.s32.totalorder %s522_s16, %s710_s17  ;;  %p715_p1 = scmp.lt.s32.totalorder %s522_s16, %s522_s16 }
  0x10   :  { %592 = vmatmul.mubr.msk.f32.gmra.mrb[6].mxu0 %vm94_vm0, %v36_v15  ;;  %86 = vperm.xlu0 %674, %v52_v16   ;;  %v40_v2 = vld [vmem:[%s922_s3 + $0x18] sm:$0xff]  ;;  %v41_v3 = vld [vmem:[%s922_s3 + $0x20] sm:$0xff]  ;;  %v42_v4 = vld [vmem:[%s922_s3 + $0x28] sm:$0xff]  ;;  %p716_p2 = scmp.lt.s32.totalorder %s714_s18, %s710_s17 }
  0x11   :  { %610 = vmatprep.mubr.msk.f32.mxu1 %vm280_vm1, %v37_v26  ;;  %v43_v5 = vld [vmem:[%s922_s3 + $0x30] sm:$0xff]  ;;  %v44_v6 = vld [vmem:[%s922_s3 + $0x38] sm:$0xff]  ;;  %638 = vmatprep.mubr.msk.f32.mxu0 %vm736_vm2, %v737_v8 }
  0x12   :  { %91 = vperm.xlu1 %675, %v53_v17   ;;  %p717_p3 = por %p716_p2, %p715_p1 }
  0x14   :  { %242 = vperm.xlu0 %674, %v232_v18   ;;  %p718_p4 = pnand %p717_p3, %p711_p0 }
  0x16   :  { %247 = vperm.xlu1 %675, %v233_v19  }
  0x18   :  { %252 = vperm.xlu0 %674, %v234_v20  }
  0x1a   :  { %257 = vperm.xlu1 %675, %v235_v21  }
  0x1c   :  { %262 = vperm.xlu0 %674, %v236_v22  }
  0x1e   :  { %267 = vperm.xlu1 %675, %v237_v23  }
  0x20   :  { %272 = vperm.xlu0 %674, %v238_v24  }
  0x22   :  { %277 = vperm.xlu1 %675, %v239_v25  }
  0x83   :  { %v57_v27 = vpop.permute.xlu0 %56 }
  0x84   :  { %v67_v28 = vpop.permute.xlu1 %66 }
  0x87   :  { %v62_v29 = vpop.permute.xlu0 %61 }
  0x89   :  { %v72_v30 = vpop.permute.xlu1 %71 }
  0x8b   :  { %v77_v40 = vpop.permute.xlu0 %76 }
  0x8d   :  { %v82_v38 = vpop.permute.xlu1 %81 }
  0x8f   :  { %v87_v48 = vpop.permute.xlu0 %86 }
  0x91   :  { %v92_v45 = vpop.permute.xlu1 %91 }
  0x93   :  { %v243_v10 = vpop.permute.xlu0 %242 }
  0x95   :  { %v248_v9 = vpop.permute.xlu1 %247 }
  0x97   :  { %v253_v13 = vpop.permute.xlu0 %252 }
  0x99   :  { %v258_v11 = vpop.permute.xlu1 %257 }
  0x9b   :  { %v263_v22 = vpop.permute.xlu0 %262 }
  0x9d   :  { %v268_v20 = vpop.permute.xlu1 %267 }
  0xd7   :  { %v584_v31 = vpop.f32.mrb[0].mxu0 }
  0xd8   :  { %v191_v32 = vadd.f32 %v584_v31, %v62_v29  ;;  %v185_v33 = vpop.f32.mrb[1].mxu0 }
  0xd9   :  { %v186_v34 = vadd.f32 %v185_v33, %v57_v27  ;;  %v278_v27 = vpop.permute.xlu1 %277 }
  0xda   :  { %676 = vtanh.f32 %v191_v32 }
  0xdb   :  { %678 = vtanh.f32 %v186_v34  ;;  %v587_v35 = vpop.f32.mrb[2].mxu0 }
  0xdc   :  { %v201_v36 = vadd.f32 %v587_v35, %v72_v30  ;;  %v195_v37 = vpop.f32.mrb[3].mxu0  ;;  %v273_v30 = vpop.permute.xlu0 %272 }
  0xdd   :  { %v196_v39 = vadd.f32 %v195_v37, %v67_v28 }
  0xde   :  { %680 = vtanh.f32 %v201_v36 }
  0xdf   :  { %682 = vtanh.f32 %v196_v39  ;;  %v590_v41 = vpop.f32.mrb[4].mxu0 }
  0xe0   :  { %v211_v42 = vadd.f32 %v590_v41, %v82_v38  ;;  %v205_v43 = vpop.f32.mrb[5].mxu0 }
  0xe1   :  { %v206_v44 = vadd.f32 %v205_v43, %v77_v40 }
  0xe2   :  { %684 = vtanh.f32 %v211_v42 }
  0xe3   :  { %686 = vtanh.f32 %v206_v44  ;;  %v593_v46 = vpop.f32.mrb[6].mxu0 }
  0xe4   :  { %v677_v47 = vpop.eup %676  ;;  %v221_v49 = vadd.f32 %v593_v46, %v92_v45  ;;  %v215_v50 = vpop.f32.mrb[7].mxu0  ;;  %v45_v45 = vld [vmem:[%s924_s5] sm:$0x1]  ;;  %v495_v46 = vmul.f32 %v782_v0, %v782_v0 }
  0xe5   :  { %v679_v51 = vpop.eup %678  ;;  %v216_v52 = vadd.f32 %v215_v50, %v87_v48 }
  0xe6   :  { %688 = vtanh.f32 %v221_v49  ;;  %v641_v53 = vpack.c.bf16 %v677_v47, %v679_v51  ;;  %v497_v47 = vsel %vm496_vm3, %v495_v46, 0.0 }
  0xe7   :  { %690 = vtanh.f32 %v216_v52  ;;  %v498_v48 = vrot.slane %v497_v47, 4 }
  0xe8   :  { %v681_v54 = vpop.eup %680  ;;  %642 = vmatprep.subr.bf16.mxu1 %v641_v53 }
  0xe9   :  { %v683_v55 = vpop.eup %682  ;;  %644 = vmatpush3.bf16.msra.mxu1 %v641_v53  ;;  %v499_v49 = vadd.f32 %v498_v48, %v497_v47 }
  0xea   :  { %v645_v56 = vpack.c.bf16 %v681_v54, %v683_v55 }
  0xeb   :  { %v500_v50 = vrot.slane %v499_v49, 2 }
  0xec   :  { %v685_v57 = vpop.eup %684  ;;  %646 = vmatprep.subr.bf16.mxu1 %v645_v56 }
  0xed   :  { %v687_v58 = vpop.eup %686  ;;  %648 = vmatpush3.bf16.msra.mxu1 %v645_v56  ;;  %v501_v51 = vadd.f32 %v500_v50, %v499_v49 }
  0xee   :  { %v649_v59 = vpack.c.bf16 %v685_v57, %v687_v58  ;;  %v492_v58 = vstv %s925_s6 }
  0xef   :  { %v502_v52 = vrot.slane %v501_v51, 1 }
  0xf0   :  { %v689_v60 = vpop.eup %688  ;;  %650 = vmatprep.subr.bf16.mxu1 %v649_v59 }
  0xf1   :  { %v691_v61 = vpop.eup %690  ;;  %652 = vmatpush3.bf16.msra.mxu1 %v649_v59  ;;  %v503_v53 = vadd.f32 %v502_v52, %v501_v51 }
  0xf2   :  { %v653_v62 = vpack.c.bf16 %v689_v60, %v691_v61 }
  0xf3   :  { %vm506_vm4 = vcmp.eq.f32.partialorder %v503_v53, inf  ;;  %v509_v56 = vand.u32 2147483648, %v503_v53  ;;  %vm508_vm5 = vcmp.eq.f32.partialorder %v503_v53, 0.0 }
  0xf4   :  { %654 = vmatprep.subr.bf16.mxu1 %v653_v62 }
  0xf5   :  { %656 = vmatpush3.bf16.msra.mxu1 %v653_v62 }
  0xf8   :  { %611 = vmatmul.mubr.msk.f32.vlgmr.msra.gmra.mrb[0].mxu1 %vm280_vm1, %v38_v63 }
  0xf9   :  { %613 = vmatprep.mubr.msk.f32.mxu1 %vm280_vm1, %v39_v1 }
  0xfc   :  { %614 = vmatmul.mubr.msk.f32.gmra.mrb[2].mxu1 %vm280_vm1, %v40_v2 }
  0xfd   :  { %616 = vmatprep.mubr.msk.f32.mxu1 %vm280_vm1, %v41_v3 }
 0x100   :  { %617 = vmatmul.mubr.msk.f32.gmra.mrb[4].mxu1 %vm280_vm1, %v42_v4 }
 0x101   :  { %619 = vmatprep.mubr.msk.f32.mxu1 %vm280_vm1, %v43_v5 }
 0x104   :  { %620 = vmatmul.mubr.msk.f32.gmra.mrb[6].mxu1 %vm280_vm1, %v44_v6 }
 0x1cb   :  { %v612_v12 = vpop.f32.mrb[0].mxu1 }
 0x1cc   :  { %v377_v14 = vadd.f32 %v612_v12, %v248_v9  ;;  %v371_v15 = vpop.f32.mrb[1].mxu1 }
 0x1cd   :  { %v372_v16 = vadd.f32 %v371_v15, %v243_v10 }
 0x1ce   :  { %692 = vtanh.f32 %v377_v14 }
 0x1cf   :  { %694 = vtanh.f32 %v372_v16  ;;  %v615_v17 = vpop.f32.mrb[2].mxu1 }
 0x1d0   :  { %v387_v18 = vadd.f32 %v615_v17, %v258_v11  ;;  %v381_v19 = vpop.f32.mrb[3].mxu1 }
 0x1d1   :  { %v382_v21 = vadd.f32 %v381_v19, %v253_v13 }
 0x1d2   :  { %696 = vtanh.f32 %v387_v18 }
 0x1d3   :  { %698 = vtanh.f32 %v382_v21  ;;  %v618_v23 = vpop.f32.mrb[4].mxu1 }
 0x1d4   :  { %v397_v24 = vadd.f32 %v618_v23, %v268_v20  ;;  %v391_v25 = vpop.f32.mrb[5].mxu1 }
 0x1d5   :  { %v392_v26 = vadd.f32 %v391_v25, %v263_v22 }
 0x1d6   :  { %700 = vtanh.f32 %v397_v24 }
 0x1d7   :  { %702 = vtanh.f32 %v392_v26  ;;  %v621_v28 = vpop.f32.mrb[6].mxu1 }
 0x1d8   :  { %v693_v29 = vpop.eup %692  ;;  %v407_v31 = vadd.f32 %v621_v28, %v278_v27  ;;  %v401_v32 = vpop.f32.mrb[7].mxu1 }
 0x1d9   :  { %v695_v33 = vpop.eup %694  ;;  %v402_v34 = vadd.f32 %v401_v32, %v273_v30 }
 0x1da   :  { %704 = vtanh.f32 %v407_v31  ;;  %v658_v35 = vpack.c.bf16 %v693_v29, %v695_v33 }
 0x1db   :  { %706 = vtanh.f32 %v402_v34 }
 0x1dc   :  { %v697_v36 = vpop.eup %696  ;;  %659 = vmatpush3.bf16.msra.mxu0 %v658_v35  ;;  %708 = vrsqrt.f32 %v503_v53 }
 0x1dd   :  { %v699_v37 = vpop.eup %698  ;;  %660 = vmatprep.subr.bf16.mxu0 %v735_v7 }
 0x1de   :  { %v661_v38 = vpack.c.bf16 %v697_v36, %v699_v37 }
 0x1e0   :  { %v701_v39 = vpop.eup %700  ;;  %662 = vmatpush3.bf16.msra.mxu0 %v661_v38 }
 0x1e1   :  { %v703_v40 = vpop.eup %702  ;;  %663 = vmatprep.subr.bf16.mxu0 %v735_v7 }
 0x1e2   :  { %v664_v41 = vpack.c.bf16 %v701_v39, %v703_v40 }
 0x1e4   :  { %v705_v42 = vpop.eup %704  ;;  %665 = vmatpush3.bf16.msra.mxu0 %v664_v41 }
 0x1e5   :  { %v707_v43 = vpop.eup %706  ;;  %666 = vmatprep.subr.bf16.mxu0 %v735_v7 }
 0x1e6   :  { %v667_v44 = vpack.c.bf16 %v705_v42, %v707_v43  ;;  %v709_v54 = vpop.eup %708 }
 0x1e7   :  { %v505_v55 = vmul.f32 %v709_v54, %v503_v53 }
 0x1e8   :  { %668 = vmatpush3.bf16.msra.mxu0 %v667_v44 }
 0x1e9   :  { %v507_v57 = vsel %vm506_vm4, %v503_v53, %v505_v55 }
 0x1ea   :  { %v510_v0 = vsel %vm508_vm5, %v509_v56, %v507_v57 }
 0x1eb   :  { %639 = vmatmul.mubr.msk.f32.vlgmr.msra.gmra.mrb[8].mxu0 %vm280_vm1, %v45_v45  ;;  %v511_v61 = vmul.f32 0.001, %v510_v0 }
 0x2be   :  { %v487_v59 = vpop.f32.mrb[8].mxu0 }
 0x2bf   :  { %v493_v60 = vsub.f32 %v487_v59, %v492_v58  ;;  %v640_v62 = vpop.f32.mrb[9].mxu0 }
 0x2c1   :  { %v494_v63 = vand.u32 2147483647, %v493_v60 }
 0x2c3   :  { %v512_v1 = vadd.f32 %v511_v61, %v494_v63 }
 0x2c5   :  { %514 = vst.msk [vmem:[#allocation3] sm:$0x1] %vm513_vm6, %v512_v1 }
 0x2c6   :  { %721 = shalt.err (!%p718_p4)
}
 0x2c7   :  { %s722_s20 = scalar_lea.hbm %s926_s7, 16 }
 0x2c8   :  { %p723_p5 = scmp.ne.s32.totalorder %s926_s7, %s722_s20  ;;  %p726_p6 = scmp.lt.u32.totalorder %s722_s20, %s926_s7 }
 0x2ca   :  { %p728_p7 = pnand %p726_p6, %p723_p5 }
 0x2cc   :  { %731 = shalt.err (!%p728_p7)
}
 0x2cd   :  { %524 = dma.vmem_to_hbm [thread:$0]  %s522_s16, 16, %s926_s7, [#allocation4]  }
 0x2ce   :  { %732 = dma.done.wait [#allocation4], 16  }
 0x2cf   :  { %733 = vsyncadd [#allocation4], 4294967280 }
 0x2d0   :  { %528 = vsyncpa [#allocation4], 1 }

</bundles_post_ra>
